<compile_context>
chip_gen: v5e
topology: v5e:2x2
jax: 0.10.0
libtpu: 0.0.40
codegen_flags: <defaults>
</compile_context>

<pallas_src>
import math

import jax
import jax.numpy as jnp
from jax.experimental import pallas as pl
from jax.experimental.pallas import tpu as pltpu


# ----------------------------------------------------------------------------
# Parameter / buffer setup (plain JAX glue): sinusoidal table, built once and
# pre-cast to the model dtype (the register_buffer analog), shape (max_len, D).
# ----------------------------------------------------------------------------
def build_pe_table(d_model: int, max_len: int = 5000,
                   dtype=jnp.float32) -> jnp.ndarray:
    position = jnp.arange(0, max_len, dtype=jnp.float32)[:, None]        # (max_len, 1)
    div_term = jnp.exp(
        jnp.arange(0, d_model, 2, dtype=jnp.float32) * (-math.log(10000.0) / d_model)
    )                                                                     # (ceil(D/2),)
    angles = position * div_term                                          # (max_len, ceil(D/2))
    pe = jnp.zeros((max_len, d_model), dtype=jnp.float32)
    pe = pe.at[:, 0::2].set(jnp.sin(angles))
    # Guard odd d_model (the PyTorch reference assumes even d_model).
    pe = pe.at[:, 1::2].set(jnp.cos(angles)[:, : d_model // 2])
    return pe.astype(dtype)                                               # (max_len, D)


# ----------------------------------------------------------------------------
# Kernels
# ----------------------------------------------------------------------------
def _pe_add_kernel_3d(x_ref, pe_ref, o_ref):
    # x_ref: (tS, B, D); pe_ref: (tS, D) -> broadcast over the batch (sublane) axis.
    o_ref[...] = (x_ref[...] + pe_ref[...][:, None, :]).astype(o_ref.dtype)


def _make_pe_add_kernel_folded(batch: int):
    # x_ref/o_ref: (tS, B*D); pe_ref: (tS, D) replicated B times along lanes.
    def kernel(x_ref, pe_ref, o_ref):
        pe = pe_ref[...]
        if batch > 1:
            pe = jnp.tile(pe, (1, batch))
        o_ref[...] = (x_ref[...] + pe).astype(o_ref.dtype)
    return kernel


# ----------------------------------------------------------------------------
# Tiling / budgeting helpers
# ----------------------------------------------------------------------------
def _round_up(x: int, m: int) -> int:
    return ((x + m - 1) // m) * m


def _vmem_budget_bytes():
    """(double-buffered footprint budget, vmem_limit_bytes) per TPU generation."""
    kind = ""
    try:
        kind = jax.devices()[0].device_kind.lower()
    except Exception:
        pass
    if ("v7" in kind) or ("7x" in kind):
        # 64 MiB physical VMEM per TC: keep headroom for compiler scratch.
        return 40 << 20, 48 << 20
    if any(t in kind for t in ("v4", "v5", "v6")):
        # 128 MiB physical VMEM: lift the 16/32 MiB default scoped limits.
        return 48 << 20, 64 << 20
    # Unknown generation -> v7x-safe defaults.
    return 32 << 20, 40 << 20


def _choose_seq_tile(S: int, x_row_bytes: int, pe_row_bytes: int,
                     budget_bytes: int, *, max_x_tile_bytes: int = 8 << 20,
                     min_grid_steps: int = 8) -> int:
    """Sequence rows per grid step, using (8,128)-PADDED VMEM accounting.

    Double-buffered footprint per step ~= 2 * (x_tile + out_tile + pe_tile).
    x_row_bytes / pe_row_bytes are the padded bytes of ONE sequence row.
    """
    per_row = 2 * (2 * x_row_bytes + pe_row_bytes)
    tS = budget_bytes // max(per_row, 1)
    # ~8 MiB x tiles already sit on the HBM roofline plateau; bigger only
    # hurts pipelining.
    tS = min(tS, max_x_tile_bytes // max(x_row_bytes, 1))
    # Keep >= ~8 grid steps when the sequence allows it (v7x: 2 TCs x >= 4
    # pipelined steps each).
    if S >= 8 * min_grid_steps:
        tS = min(tS, pl.cdiv(S, min_grid_steps))
    tS = max(8, min(tS, S))
    tS = max(8, (tS // 8) * 8)            # multiple of 8 -> unpadded sublanes
    # Prefer a nearby multiple of 8 that divides S so the last block is not a
    # masked partial store; never shrink below half the target.
    for cand in range(tS, max(7, tS // 2 - 1), -8):
        if S % cand == 0:
            return cand
    return tS
    # TODO(synk): if a single 8-row tile still exceeds VMEM (huge B*D), the
    # model dim would also need lane tiling; not needed at these shapes.


# ----------------------------------------------------------------------------
# Forward wrapper: x + pe[:S] broadcast over batch.
# ----------------------------------------------------------------------------
def positional_encoding_forward(x: jnp.ndarray, pe: jnp.ndarray) -> jnp.ndarray:
    """x: (S, B, D); pe: (max_len, D) buffer.  Returns x + pe[:S, None, :]."""
    S, B, D = x.shape
    assert pe.ndim == 2 and pe.shape[0] >= S and pe.shape[1] == D

    x_isz = jnp.dtype(x.dtype).itemsize
    pe_isz = jnp.dtype(pe.dtype).itemsize
    x_sublanes = 32 // x_isz                    # 8 (f32), 16 (bf16), 32 (i8)
    budget, vmem_limit = _vmem_budget_bytes()
    cparams = pltpu.CompilerParams(
        dimension_semantics=("parallel",),      # shard seq tiles across v7x's 2 TCs
        vmem_limit_bytes=vmem_limit,
    )

    if B < x_sublanes:
        # --- Small batch: fold batch into the lane axis (free contiguous reshape).
        x2 = x.reshape(S, B * D)
        x_row = _round_up(B * D, 128) * x_isz
        pe_row = _round_up(D, 128) * pe_isz
        tS = _choose_seq_tile(S, x_row, pe_row, budget)
        out2 = pl.pallas_call(
            _make_pe_add_kernel_folded(B),
            out_shape=jax.ShapeDtypeStruct((S, B * D), x.dtype),
            grid=(pl.cdiv(S, tS),),
            in_specs=[
                pl.BlockSpec((tS, B * D), lambda i: (i, 0)),
                pl.BlockSpec((tS, D), lambda i: (i, 0)),
            ],
            out_specs=pl.BlockSpec((tS, B * D), lambda i: (i, 0)),
            compiler_params=cparams,
        )(x2, pe)
        return out2.reshape(S, B, D)

    # --- Batch fills the sublanes: keep the natural (S, B, D) layout.
    x_row = _round_up(B, x_sublanes) * _round_up(D, 128) * x_isz
    pe_row = _round_up(D, 128) * pe_isz
    tS = _choose_seq_tile(S, x_row, pe_row, budget)
    return pl.pallas_call(
        _pe_add_kernel_3d,
        out_shape=jax.ShapeDtypeStruct((S, B, D), x.dtype),
        grid=(pl.cdiv(S, tS),),
        in_specs=[
            pl.BlockSpec((tS, B, D), lambda i: (i, 0, 0)),
            pl.BlockSpec((tS, D), lambda i: (i, 0)),
        ],
        out_specs=pl.BlockSpec((tS, B, D), lambda i: (i, 0, 0)),
        compiler_params=cparams,
    )(x, pe)


if __name__ == "__main__":
    max_len = 5000

    # --- Test 1: small shapes consistent with the module: (seq, batch, d_model).
    seq_len, batch, d_model = 8, 2, 32
    x = jax.random.normal(jax.random.PRNGKey(0), (seq_len, batch, d_model),
                          dtype=jnp.float32)
    pe = build_pe_table(d_model, max_len)
    out = jax.block_until_ready(positional_encoding_forward(x, pe))
    ref = x + pe[:seq_len][:, None, :]
    assert out.shape == (seq_len, batch, d_model)
    assert jnp.allclose(out, ref, atol=1e-6, rtol=1e-6)

    # --- Test 2: longer sequence, lane-dense D, small batch (folded layout,
    # several grid steps exercising the DMA pipeline).
    seq_len2, batch2, d_model2 = 256, 2, 128
    x2 = jax.random.normal(jax.random.PRNGKey(1), (seq_len2, batch2, d_model2),
                           dtype=jnp.float32)
    pe2 = build_pe_table(d_model2, max_len)
    out2 = jax.block_until_ready(positional_encoding_forward(x2, pe2))
    ref2 = x2 + pe2[:seq_len2][:, None, :]
    assert out2.shape == (seq_len2, batch2, d_model2)
    assert jnp.allclose(out2, ref2, atol=1e-6, rtol=1e-6)

    # --- Test 3: batch >= 8 exercises the natural 3-D path (sublane broadcast).
    seq_len3, batch3, d_model3 = 64, 8, 128
    x3 = jax.random.normal(jax.random.PRNGKey(2), (seq_len3, batch3, d_model3),
                           dtype=jnp.float32)
    pe3 = build_pe_table(d_model3, max_len)
    out3 = jax.block_until_ready(positional_encoding_forward(x3, pe3))
    ref3 = x3 + pe3[:seq_len3][:, None, :]
    assert out3.shape == (seq_len3, batch3, d_model3)
    assert jnp.allclose(out3, ref3, atol=1e-6, rtol=1e-6)

    print("KERNEL_OK")
</pallas_src>

<mosaic_0001>
module attributes {stable_mosaic.version = 11 : i64} {
  func.func @kernel(%arg0: i32, %arg1: memref<8x64xf32, #tpu.memory_space<vmem>>, %arg2: memref<8x32xf32, #tpu.memory_space<vmem>>, %arg3: memref<8x64xf32, #tpu.memory_space<vmem>>) attributes {dimension_semantics = [#tpu.dimension_semantics<parallel>], iteration_bounds = array<i64: 1>, scalar_prefetch = 0 : i64, scratch_operands = 0 : i64, tpu.core_type = #tpu.core_type<tc>, window_params = [{transform_indices = @transform_0, window_bounds = array<i64: 8, 64>}, {transform_indices = @transform_1, window_bounds = array<i64: 8, 32>}, {transform_indices = @transform_2, window_bounds = array<i64: 8, 64>}]} {
    %c0 = arith.constant 0 : index
    %c0_0 = arith.constant 0 : index
    %0 = vector.load %arg2[%c0, %c0_0] : memref<8x32xf32, #tpu.memory_space<vmem>>, vector<8x32xf32>
    %1 = tpu.concatenate %0, %0 in 1 : vector<8x32xf32>, vector<8x32xf32> -> vector<8x64xf32>
    %c0_1 = arith.constant 0 : index
    %c0_2 = arith.constant 0 : index
    %2 = vector.load %arg1[%c0_1, %c0_2] : memref<8x64xf32, #tpu.memory_space<vmem>>, vector<8x64xf32>
    %3 = arith.addf %2, %1 : vector<8x64xf32>
    %c0_3 = arith.constant 0 : index
    %c0_4 = arith.constant 0 : index
    %4 = vector.load %arg3[%c0_3, %c0_4] : memref<8x64xf32, #tpu.memory_space<vmem>>, vector<8x64xf32>
    tpu.vector_store %arg3[%c0_3, %c0_4], %3 {strides = array<i32>} : memref<8x64xf32, #tpu.memory_space<vmem>>, vector<8x64xf32>,
    return
  }
  func.func @transform_0(%arg0: i32) -> (i32, i32) {
    %c0_i32 = arith.constant 0 : i32
    %c0_i32_0 = arith.constant 0 : i32
    return %arg0, %c0_i32 : i32, i32
  }
  func.func @transform_1(%arg0: i32) -> (i32, i32) {
    %c0_i32 = arith.constant 0 : i32
    %c0_i32_0 = arith.constant 0 : i32
    return %arg0, %c0_i32 : i32, i32
  }
  func.func @transform_2(%arg0: i32) -> (i32, i32) {
    %c0_i32 = arith.constant 0 : i32
    %c0_i32_0 = arith.constant 0 : i32
    return %arg0, %c0_i32 : i32, i32
  }
}

</mosaic_0001>

<bundles_post_ra>
// kernel: tpu_custom_call.1
= control target key start
LH: loop header
LB: loop body
LE: loop exit
PB: predicated region body
PF: predicated region fallthrough
CT: control target
= control target key end

     0   :  { %s93_s0 = inlined_call_operand.vmem [shape: f32[8,64], index: 0, kind: input, shape index: {}]   ;;  %s94_s1 = inlined_call_operand.vmem [shape: f32[5000,32], index: 1, kind: input, shape index: {}]   ;;  %s95_s2 = inlined_call_operand.hbm [shape: f32[8,64], index: 2, kind: output, shape index: {}]  }
   0x1   :  { %v12_v0 = vld [vmem:[%s94_s1] sm:$0xff] }
   0x2   :  { %7 = vsyncpa [#allocation3], 0  ;;  %s67_s11 = smov 32   ;;  %vm17_vm0 = vcmask 261120   ;;  %v19_v1 = vld [vmem:[%s93_s0] sm:$0xff]  ;;  %s68_s14 = smov [#allocation2]  }
   0x3   :  { %14 = vrot.lane.b32.xlu0 %v12_v0, %s67_s11  ;;  %s28_s15 = sshll.u32 %s68_s14, 4  ;;  %s30_s18 = sshll.u32 %s95_s2, 4  ;;  %vm21_vm1 = vcmask 523264   ;;  %s29_s15 = int_to_ptr.vmem [resolvable:$true] %s28_s15  ;;  %s31_s18 = int_to_ptr.hbm [resolvable:$true] %s30_s18 }
  0x75   :  { %v15_v2 = vpop.permute.xlu0 %14 }
  0x76   :  { %v18_v3 = vsel %vm17_vm0, %v12_v0, %v15_v2 }
  0x77   :  { %v20_v4 = vadd.f32 %v19_v1, %v18_v3 }
  0x79   :  { %22 = vst.msk [vmem:[#allocation2] sm:$0xff] %vm21_vm1, %v20_v4 }
  0x7a   :  { %33 = dma.vmem_to_hbm [thread:$0]  %s29_s15, 128, %s31_s18, [#allocation3]  }
  0x7b   :  { %65 = dma.done.wait [#allocation3], 128  }
  0x7c   :  { %66 = vsyncadd [#allocation3], 4294967168 }
  0x7d   :  { %38 = vsyncpa [#allocation3], 1 }

</bundles_post_ra>
